<compile_context>
chip_gen: v7x
topology: tpu7x:2x2x1
jax: 0.10.0
libtpu: 0.0.40
codegen_flags: <defaults>
</compile_context>

<pallas_src>
import jax
import jax.numpy as jnp
from jax.experimental import pallas as pl
from jax.experimental.pallas import tpu as pltpu


def _linear_kernel(x_ref, wt_ref, b_ref, o_ref):
    # x_ref:  (TM, Din)  tile of flattened inputs (pipelined over the batch)
    # wt_ref: (Din, C)   transposed weight, resident across the grid
    # b_ref:  (1, C)     bias, resident across the grid
    # o_ref:  (TM, C)    logits tile, directly in PyTorch (N, C) layout
    acc = jnp.dot(x_ref[...], wt_ref[...], preferred_element_type=jnp.float32)
    o_ref[...] = (acc + b_ref[...]).astype(o_ref.dtype)


def logistic_regression_forward(x, weight, bias, *, target_x_buffer_bytes=4 << 20):
    """Forward pass of LogisticRegression (logits only, matching module.forward).

    x:      (N, D, T) float32
    weight: (C, D*T)  float32 (PyTorch nn.Linear weight layout, NOT transposed)
    bias:   (C,)      float32
    returns (N, C)    float32 logits
    """
    N, D, T = x.shape
    Din = D * T
    C = weight.shape[0]

    # Same element order as torch X.view([N, T*D]) on a contiguous (N, D, T) tensor.
    x_flat = x.reshape(N, Din)
    w_t = weight.T              # (Din, C): tiny one-time transpose (Din*C*4 bytes)
    b2 = bias.reshape(1, C)

    # --- choose batch tile size --------------------------------------------------
    # ~4 MiB per X buffer (8 MiB double-buffered) amortizes per-step overhead while
    # fitting every generation's scoped-VMEM default (v5e 16 MiB, v6e/v7x 32 MiB).
    row_bytes = Din * 4
    tm = max(128, (target_x_buffer_bytes // row_bytes) // 128 * 128)

    if N <= 2 * tm:
        if N >= 256:
            # At least 2 grid steps so the "parallel" axis can shard across v7x's
            # two TensorCores (per-TC HBM bandwidth).
            tm = ((-(-N // 2)) + 127) // 128 * 128
        else:
            tm = N  # single full-extent block (exempt from the (8,128) rule)

    # No padding: Pallas clips the partial trailing block. OOB reads there are
    # unspecified but only affect output rows >= N, whose writeback is dropped.
    grid = (pl.cdiv(N, tm),)

    cost = pl.CostEstimate(
        flops=2 * N * Din * C,
        transcendentals=0,
        bytes_accessed=N * Din * 4 + Din * C * 4 + N * C * 4,
    )

    # TODO(synk): if Din ever grows past a few thousand, add a K (Din) reduction
    # grid axis (last, "arbitrary") with an f32 VMEM accumulator (P3 pattern).
    out = pl.pallas_call(
        _linear_kernel,
        out_shape=jax.ShapeDtypeStruct((N, C), jnp.float32),
        grid_spec=pltpu.PrefetchScalarGridSpec(
            num_scalar_prefetch=0,
            grid=grid,
            in_specs=[
                pl.BlockSpec((tm, Din), lambda i: (i, 0)),   # X tile (pipelined over N)
                pl.BlockSpec((Din, C), lambda i: (0, 0)),    # W^T, resident across grid
                pl.BlockSpec((1, C), lambda i: (0, 0)),      # bias, resident across grid
            ],
            out_specs=pl.BlockSpec((tm, C), lambda i: (i, 0)),
        ),
        compiler_params=pltpu.CompilerParams(
            dimension_semantics=("parallel",),   # N-grid shards across TCs on v7x
        ),
        cost_estimate=cost,
    )(x_flat, w_t, b2)

    return out


if __name__ == "__main__":
    # args.x_dim=16, args.t_dim=8, args.c_dim=4, batch N=8
    N, D, T, C = 8, 16, 8, 4
    key = jax.random.PRNGKey(0)
    kx, kw, kb = jax.random.split(key, 3)

    x = jax.random.normal(kx, (N, D, T), dtype=jnp.float32)
    # Deterministic parameter init (synthetic; mimics nn.Linear shapes / layout)
    weight = jax.random.normal(kw, (C, D * T), dtype=jnp.float32) * 0.05
    bias = jax.random.normal(kb, (C,), dtype=jnp.float32) * 0.05

    y = logistic_regression_forward(x, weight, bias)
    jax.block_until_ready(y)

    # Reference check in plain JAX (mirrors PyTorch: X.view([N, T*D]) @ W.T + b)
    y_ref = x.reshape(N, D * T) @ weight.T + bias
    assert y.shape == (N, C)
    assert jnp.allclose(y, y_ref, atol=1e-5, rtol=1e-5), "mismatch vs reference"

    # Multi-block path with a ragged trailing block (exercises the no-pad cdiv grid).
    N2 = 300
    x2 = jax.random.normal(jax.random.PRNGKey(1), (N2, D, T), dtype=jnp.float32)
    y2 = logistic_regression_forward(x2, weight, bias)
    jax.block_until_ready(y2)
    y2_ref = x2.reshape(N2, D * T) @ weight.T + bias
    assert y2.shape == (N2, C)
    assert jnp.allclose(y2, y2_ref, atol=1e-5, rtol=1e-5), "tiled/ragged path mismatch"

    print("KERNEL_OK")
</pallas_src>

<mosaic_0001>
module attributes {stable_mosaic.version = 11 : i64} {
  func.func @_linear_kernel(%arg0: i32, %arg1: memref<8x128xf32, #tpu.memory_space<vmem>>, %arg2: memref<128x4xf32, #tpu.memory_space<vmem>>, %arg3: memref<1x4xf32, #tpu.memory_space<vmem>>, %arg4: memref<8x4xf32, #tpu.memory_space<vmem>>) attributes {dimension_semantics = [#tpu.dimension_semantics<parallel>], iteration_bounds = array<i64: 1>, scalar_prefetch = 0 : i64, scratch_operands = 0 : i64, tpu.core_type = #tpu.core_type<tc>, window_params = [{transform_indices = @transform_0, window_bounds = array<i64: 8, 128>}, {pipeline_mode = #tpu.pipeline_mode<synchronous>, transform_indices = @transform_1, window_bounds = array<i64: 128, 4>}, {pipeline_mode = #tpu.pipeline_mode<synchronous>, transform_indices = @transform_2, window_bounds = array<i64: 1, 4>}, {transform_indices = @transform_3, window_bounds = array<i64: 8, 4>}]} {
    %c0 = arith.constant 0 : index
    %c0_0 = arith.constant 0 : index
    %0 = vector.load %arg1[%c0, %c0_0] : memref<8x128xf32, #tpu.memory_space<vmem>>, vector<8x128xf32>
    %c0_1 = arith.constant 0 : index
    %c0_2 = arith.constant 0 : index
    %1 = vector.load %arg2[%c0_1, %c0_2] : memref<128x4xf32, #tpu.memory_space<vmem>>, vector<128x4xf32>
    %cst = arith.constant dense<0.000000e+00> : vector<8x4xf32>
    %2 = tpu.matmul %0, %1, %cst {dimension_numbers = #tpu.dot_dimension_numbers<[1], [0], [0], [1], [0, 0, 1, 1], [], []>} : vector<8x128xf32>, vector<128x4xf32>, vector<8x4xf32> -> vector<8x4xf32>
    %c0_3 = arith.constant 0 : index
    %c0_4 = arith.constant 0 : index
    %3 = vector.load %arg3[%c0_3, %c0_4] : memref<1x4xf32, #tpu.memory_space<vmem>>, vector<1x4xf32>
    %4 = vector.broadcast %3 : vector<1x4xf32> to vector<8x4xf32>
    %5 = arith.addf %2, %4 : vector<8x4xf32>
    %c0_5 = arith.constant 0 : index
    %c0_6 = arith.constant 0 : index
    %6 = vector.load %arg4[%c0_5, %c0_6] : memref<8x4xf32, #tpu.memory_space<vmem>>, vector<8x4xf32>
    tpu.vector_store %arg4[%c0_5, %c0_6], %5 {strides = array<i32>} : memref<8x4xf32, #tpu.memory_space<vmem>>, vector<8x4xf32>,
    return
  }
  func.func @transform_0(%arg0: i32) -> (i32, i32) {
    %c0_i32 = arith.constant 0 : i32
    %c0_i32_0 = arith.constant 0 : i32
    return %arg0, %c0_i32 : i32, i32
  }
  func.func @transform_1(%arg0: i32) -> (i32, i32) {
    %c0_i32 = arith.constant 0 : i32
    %c0_i32_0 = arith.constant 0 : i32
    %c0_i32_1 = arith.constant 0 : i32
    return %c0_i32, %c0_i32_0 : i32, i32
  }
  func.func @transform_2(%arg0: i32) -> (i32, i32) {
    %c0_i32 = arith.constant 0 : i32
    %c0_i32_0 = arith.constant 0 : i32
    %c0_i32_1 = arith.constant 0 : i32
    return %c0_i32, %c0_i32_0 : i32, i32
  }
  func.func @transform_3(%arg0: i32) -> (i32, i32) {
    %c0_i32 = arith.constant 0 : i32
    %c0_i32_0 = arith.constant 0 : i32
    return %arg0, %c0_i32 : i32, i32
  }
}

</mosaic_0001>

<bundles_post_ra>
// kernel: tpu_custom_call.1
= control target key start
LH: loop header
LB: loop body
LE: loop exit
PB: predicated region body
PF: predicated region fallthrough
CT: control target
= control target key end

     0   :  { %v194_v0 = vmov 0.0|0.0   ;;  %vm195_vm0 = vmmov 0   ;;  %v196_v4 = vmov 0.0   ;;  %vm108_vm1 = vcmask 31744   ;;  %s274_s1 = inlined_call_operand.vmem [shape: f32[128,4], index: 1, kind: input, shape index: {}]   ;;  %s275_s0 = inlined_call_operand.vmem [shape: f32[8,128], index: 0, kind: input, shape index: {}]   ;;  %s276_s2 = inlined_call_operand.vmem [shape: f32[1,4], index: 2, kind: input, shape index: {}]   ;;  %s277_s3 = inlined_call_operand.vmem [shape: f32[8,4], index: 3, kind: output, shape index: {}]  }
   0x1   :  { %167 = vmatprep.subr.bf16.mxu0 %v194_v0  ;;  %v15_v1 = vld [vmem:[%s274_s1] sm:$0xff]  ;;  %v16_v2 = vld [vmem:[%s274_s1 + $0x8] sm:$0xff]  ;;  %v17_v3 = vld [vmem:[%s274_s1 + $0x10] sm:$0xff]  ;;  %164 = vmatprep.mubr.msk.f32.mxu0 %vm195_vm0, %v196_v4 }
   0x2   :  { %v168_v5 = vpack.c.bf16 %v16_v2, %v15_v1  ;;  %v18_v6 = vld [vmem:[%s274_s1 + $0x18] sm:$0xff]  ;;  %v19_v8 = vld [vmem:[%s274_s1 + $0x20] sm:$0xff]  ;;  %v20_v9 = vld [vmem:[%s274_s1 + $0x28] sm:$0xff] }
   0x3   :  { %v171_v7 = vpack.c.bf16 %v18_v6, %v17_v3  ;;  %v174_v10 = vpack.c.bf16 %v20_v9, %v19_v8  ;;  %v21_v11 = vld [vmem:[%s274_s1 + $0x30] sm:$0xff]  ;;  %v22_v12 = vld [vmem:[%s274_s1 + $0x38] sm:$0xff]  ;;  %v23_v14 = vld [vmem:[%s274_s1 + $0x40] sm:$0xff] }
   0x4   :  { %169 = vmatpush3.bf16.msra.mxu0 %v168_v5  ;;  %v177_v13 = vpack.c.bf16 %v22_v12, %v21_v11  ;;  %v24_v15 = vld [vmem:[%s274_s1 + $0x48] sm:$0xff]  ;;  %v25_v17 = vld [vmem:[%s274_s1 + $0x50] sm:$0xff]  ;;  %v26_v18 = vld [vmem:[%s274_s1 + $0x58] sm:$0xff] }
   0x5   :  { %170 = vmatprep.subr.bf16.mxu0 %v194_v0  ;;  %v180_v16 = vpack.c.bf16 %v24_v15, %v23_v14  ;;  %v183_v19 = vpack.c.bf16 %v26_v18, %v25_v17  ;;  %v27_v20 = vld [vmem:[%s274_s1 + $0x60] sm:$0xff]  ;;  %v28_v21 = vld [vmem:[%s274_s1 + $0x68] sm:$0xff]  ;;  %v29_v23 = vld [vmem:[%s274_s1 + $0x70] sm:$0xff] }
   0x6   :  { %v186_v22 = vpack.c.bf16 %v28_v21, %v27_v20  ;;  %v30_v24 = vld [vmem:[%s274_s1 + $0x78] sm:$0xff]  ;;  %v14_v26 = vld [vmem:[%s275_s0] sm:$0xff] }
   0x7   :  { %v189_v25 = vpack.c.bf16 %v30_v24, %v29_v23  ;;  %v114_v27 = vld [vmem:[%s276_s2] ss:$0 sm:$0xff] }
   0x8   :  { %172 = vmatpush3.bf16.msra.mxu0 %v171_v7 }
   0x9   :  { %173 = vmatprep.subr.bf16.mxu0 %v194_v0 }
   0xc   :  { %175 = vmatpush3.bf16.msra.mxu0 %v174_v10 }
   0xd   :  { %176 = vmatprep.subr.bf16.mxu0 %v194_v0 }
  0x10   :  { %178 = vmatpush3.bf16.msra.mxu0 %v177_v13 }
  0x11   :  { %179 = vmatprep.subr.bf16.mxu0 %v194_v0 }
  0x14   :  { %181 = vmatpush3.bf16.msra.mxu0 %v180_v16 }
  0x15   :  { %182 = vmatprep.subr.bf16.mxu0 %v194_v0 }
  0x18   :  { %184 = vmatpush3.bf16.msra.mxu0 %v183_v19 }
  0x19   :  { %185 = vmatprep.subr.bf16.mxu0 %v194_v0 }
  0x1c   :  { %187 = vmatpush3.bf16.msra.mxu0 %v186_v22 }
  0x1d   :  { %188 = vmatprep.subr.bf16.mxu0 %v194_v0 }
  0x20   :  { %190 = vmatpush3.bf16.msra.mxu0 %v189_v25 }
  0x23   :  { %165 = vmatmul.mubr.f32.vlgmr.msra.gmra.mrb[0].mxu0 %v14_v26 }
  0xf6   :  { %v104_v28 = vpop.f32.mrb[0].mxu0 }
  0xf7   :  { %v105_v29 = vadd.f32 %v114_v27, %v104_v28  ;;  %v166_v30 = vpop.f32.mrb[1].mxu0 }
  0xf9   :  { %109 = vst.msk [vmem:[%s277_s3] sm:$0xff] %vm108_vm1, %v105_v29 }

</bundles_post_ra>
